<compile_context>
chip_gen: v7x
topology: tpu7x:2x2x1
jax: 0.10.0
libtpu: 0.0.40
codegen_flags: <defaults>
</compile_context>

<pallas_src>
import functools

import jax
import jax.numpy as jnp
from jax.experimental import pallas as pl
from jax.experimental.pallas import tpu as pltpu


def _layernorm(z, gamma, beta, eps=1e-5):
    mu = jnp.mean(z, axis=-1, keepdims=True)
    var = jnp.mean((z - mu) ** 2, axis=-1, keepdims=True)
    return (z - mu) * jax.lax.rsqrt(var + eps) * gamma + beta


def _xattn_kernel(
    x_ref, media_ref,
    g_ref, b_ref, wq_ref, wk_ref, wv_ref, wo_ref,
    o_ref,
    k_cache, v_cache,
    *, heads, dim_head,
):
    ni = pl.program_id(1)

    # ---- k/v projections: once per batch element, cached in VMEM scratch (bf16) ----
    @pl.when(ni == 0)
    def _():
        med = media_ref[...]                                                  # (TM, D) bf16
        k2 = jnp.dot(med, wk_ref[...], preferred_element_type=jnp.float32)    # (TM, H*dh) f32
        v2 = jnp.dot(med, wv_ref[...], preferred_element_type=jnp.float32)
        tm = med.shape[0]
        k_cache[...] = k2.astype(jnp.bfloat16).reshape(tm, heads, dim_head).transpose(1, 0, 2)
        v_cache[...] = v2.astype(jnp.bfloat16).reshape(tm, heads, dim_head).transpose(1, 0, 2)

    # ---- LayerNorm (f32 statistics) ----
    x = x_ref[...].astype(jnp.float32)                       # (tn, D)
    xn = _layernorm(x, g_ref[...], b_ref[...])
    xn_b = xn.astype(jnp.bfloat16)

    # ---- q projection (scale already folded into wq by prepare_params) ----
    q2 = jnp.dot(xn_b, wq_ref[...], preferred_element_type=jnp.float32)       # (tn, H*dh)
    tn = q2.shape[0]
    q3 = q2.astype(jnp.bfloat16).reshape(tn, heads, dim_head).transpose(1, 0, 2)  # (H, tn, dh)

    k3 = k_cache[...]                                         # (H, TM, dh) bf16
    v3 = v_cache[...]                                         # (H, TM, dh) bf16

    # ---- head-batched attention ----
    sim = jax.lax.dot_general(
        q3, k3, (((2,), (2,)), ((0,), (0,))),
        preferred_element_type=jnp.float32)                   # (H, tn, TM) f32

    sim = sim - jnp.max(sim, axis=-1, keepdims=True)
    p = jnp.exp(sim)
    attn = (p * pl.reciprocal(jnp.sum(p, axis=-1, keepdims=True), approx=True)
            ).astype(jnp.bfloat16)

    out3 = jax.lax.dot_general(
        attn, v3, (((2,), (1,)), ((0,), (0,))),
        preferred_element_type=jnp.float32)                   # (H, tn, dh) f32

    # ---- output projection: batched per-head contraction against wo (H, dh, D), then
    #      reduce over heads (no transpose/reshape of lane-narrow tensors) ----
    y3 = jax.lax.dot_general(
        out3.astype(jnp.bfloat16), wo_ref[...], (((2,), (1,)), ((0,), (0,))),
        preferred_element_type=jnp.float32)                   # (H, tn, D) f32
    o_ref[...] = jnp.sum(y3, axis=0).astype(o_ref.dtype)


# ---------------------------------------------------------------------------
# VMEM-aware, per-generation tile sizing.
# ---------------------------------------------------------------------------

def _round_up(x, m):
    return (x + m - 1) // m * m


def _vmem_limit_bytes():
    cap = 64 * 1024 * 1024                       # conservative default (v7x per-TC VMEM)
    try:
        info = pltpu.get_tpu_info()
        cap = getattr(info, "vmem_capacity_bytes", None) or cap
    except Exception:
        pass
    # ~3/4 of physical, capped: ~96 MiB on v5e/v6e (128 MiB), ~48 MiB on v7x (64 MiB).
    return min(int(cap * 3 // 4), 100 * 1024 * 1024)


def _estimate_vmem_bytes(tn, *, D, TM, heads, dim_head, inner):
    """Padding-aware rough estimate of VMEM use for one N-tile."""
    f32, bf16 = 4, 2
    lane = 128

    def tile(r, c, sub):
        return _round_up(max(r, 1), sub) * _round_up(max(c, 1), lane)

    # double-buffered pipeline blocks
    x_blk = 2 * tile(tn, D, 8) * f32
    o_blk = 2 * tile(tn, D, 8) * f32
    med_blk = 2 * tile(TM, D, 16) * bf16
    w_blk = 2 * (3 * tile(D, inner, 16) + heads * tile(dim_head, D, 16)) * bf16
    ln_blk = 2 * 2 * tile(1, D, 8) * f32
    # persistent k/v caches
    cache = 2 * heads * tile(TM, dim_head, 16) * bf16
    # in-kernel live intermediates (approximate)
    sim = 2 * heads * tile(tn, TM, 8) * f32
    qkv = 3 * heads * tile(tn, dim_head, 16) * bf16
    out3 = heads * tile(tn, dim_head, 8) * f32
    y3 = heads * tile(tn, D, 8) * f32
    xn = 2 * tile(tn, D, 8) * f32
    return x_blk + o_blk + med_blk + w_blk + ln_blk + cache + sim + qkv + out3 + y3 + xn


def _pick_tile_n(N, vmem_budget, **dims):
    for cand in (2048, 1024, 512, 256, 128, 64, 32, 16, 8):
        if cand <= N and N % cand == 0 and _estimate_vmem_bytes(cand, **dims) <= vmem_budget:
            return cand
    return N


# ---------------------------------------------------------------------------
# Wrapper
# ---------------------------------------------------------------------------

def prepare_params(params, *, heads, dim_head):
    """One-time parameter conversion (do NOT call per forward): fold the q-scale, cast the
    matmul weights to bf16, and reshape wo to (H, dh, D) for the in-kernel head contraction."""
    scale = dim_head ** (-0.5)
    wo3 = params["wo"].astype(jnp.bfloat16).reshape(heads, dim_head, -1)
    return {
        "g": params["g"].astype(jnp.float32),
        "b": params["b"].astype(jnp.float32),
        "wq": (params["wq"] * scale).astype(jnp.bfloat16),
        "wk": params["wk"].astype(jnp.bfloat16),
        "wv": params["wv"].astype(jnp.bfloat16),
        "wo3": wo3,
    }


def masked_cross_attention(x, media, prepared, *, heads, dim_head):
    """x: (B, N, D) f32; media: (B, T, M, D) or (B, T*M, D), ideally already bf16."""
    B, N, D = x.shape
    if media.ndim == 4:
        media = media.reshape(media.shape[0], -1, media.shape[-1])     # (B, T*M, D)
    if media.dtype != jnp.bfloat16:
        media = media.astype(jnp.bfloat16)   # defensive; upstream should keep media in bf16
    TM = media.shape[1]
    inner = heads * dim_head

    vmem_limit = _vmem_limit_bytes()
    tn = _pick_tile_n(N, int(vmem_limit * 0.85),
                      D=D, TM=TM, heads=heads, dim_head=dim_head, inner=inner)
    grid = (B, N // tn)

    kernel = functools.partial(_xattn_kernel, heads=heads, dim_head=dim_head)

    def const_spec(arr):
        nd = arr.ndim
        return pl.BlockSpec(arr.shape, lambda bi, ni: (0,) * nd)

    return pl.pallas_call(
        kernel,
        out_shape=jax.ShapeDtypeStruct((B, N, D), x.dtype),
        grid_spec=pltpu.PrefetchScalarGridSpec(
            num_scalar_prefetch=0,
            grid=grid,
            in_specs=[
                pl.BlockSpec((None, tn, D), lambda bi, ni: (bi, ni, 0)),   # x (batch squeezed)
                pl.BlockSpec((None, TM, D), lambda bi, ni: (bi, 0, 0)),    # media (bf16)
                const_spec(prepared["g"]), const_spec(prepared["b"]),
                const_spec(prepared["wq"]), const_spec(prepared["wk"]),
                const_spec(prepared["wv"]), const_spec(prepared["wo3"]),
            ],
            out_specs=pl.BlockSpec((None, tn, D), lambda bi, ni: (bi, ni, 0)),
            scratch_shapes=[
                pltpu.VMEM((heads, TM, dim_head), jnp.bfloat16),   # k cache (per batch elem)
                pltpu.VMEM((heads, TM, dim_head), jnp.bfloat16),   # v cache
            ],
        ),
        compiler_params=pltpu.CompilerParams(
            # B parallel (megacore); N arbitrary so the per-batch k/v cache stays valid.
            dimension_semantics=("parallel", "arbitrary"),
            vmem_limit_bytes=vmem_limit,
        ),
    )(x, media, prepared["g"], prepared["b"],
      prepared["wq"], prepared["wk"], prepared["wv"], prepared["wo3"])


# ---------------------------------------------------------------------------
# Test harness
# ---------------------------------------------------------------------------

def make_params(key, dim, heads, dim_head):
    inner = heads * dim_head
    ks = jax.random.split(key, 4)
    init = lambda k, shp: (0.02 * jax.random.normal(k, shp)).astype(jnp.float32)
    # Linear weights stored pre-transposed: (in_features, out_features).
    # wk / wv together correspond to PyTorch's to_kv followed by chunk(2, dim=-1).
    return {
        "g": jnp.ones((1, dim), jnp.float32),
        "b": jnp.zeros((1, dim), jnp.float32),
        "wq": init(ks[0], (dim, inner)),
        "wk": init(ks[1], (dim, inner)),
        "wv": init(ks[2], (dim, inner)),
        "wo": init(ks[3], (inner, dim)),
    }


def reference(x, media, params, *, heads, dim_head):
    """Pure-JAX f32 reference of the PyTorch MaskedCrossAttention forward (no masks)."""
    B, N, D = x.shape
    med = media.reshape(B, -1, D)
    scale = dim_head ** (-0.5)
    xn = _layernorm(x, params["g"][0], params["b"][0])
    q = xn @ params["wq"]
    k = med @ params["wk"]
    v = med @ params["wv"]
    split = lambda a: a.reshape(a.shape[0], a.shape[1], heads, dim_head).transpose(0, 2, 1, 3)
    q, k, v = split(q) * scale, split(k), split(v)
    sim = jnp.einsum("bhid,bhjd->bhij", q, k)
    sim = sim - jnp.max(sim, axis=-1, keepdims=True)
    attn = jax.nn.softmax(sim, axis=-1)
    out = jnp.einsum("bhij,bhjd->bhid", attn, v)
    out = out.transpose(0, 2, 1, 3).reshape(B, N, heads * dim_head)
    return out @ params["wo"]


if __name__ == "__main__":
    B, N, D = 2, 8, 32
    T, M = 2, 4
    heads, dim_head = 4, 8

    root = jax.random.PRNGKey(0)
    kx, kmed, kp = jax.random.split(root, 3)
    x = jax.random.normal(kx, (B, N, D), dtype=jnp.float32)
    media = jax.random.normal(kmed, (B, T, M, D), dtype=jnp.float32)
    params = make_params(kp, D, heads, dim_head)

    # One-time conversions (kept out of the per-call forward path).
    prepared = prepare_params(params, heads=heads, dim_head=dim_head)
    media_bf16 = media.reshape(B, T * M, D).astype(jnp.bfloat16)

    out = masked_cross_attention(x, media_bf16, prepared, heads=heads, dim_head=dim_head)
    out = jax.block_until_ready(out)

    ref = reference(x, media, params, heads=heads, dim_head=dim_head)
    assert out.shape == (B, N, D)
    max_err = float(jnp.max(jnp.abs(out - ref)))
    assert jnp.allclose(out, ref, atol=2e-3, rtol=2e-3), f"mismatch vs reference, max abs err={max_err}"

    print("KERNEL_OK")
</pallas_src>

<mosaic_0001>
module attributes {stable_mosaic.version = 11 : i64} {
  func.func @_xattn_kernel(%arg0: i32, %arg1: i32, %arg2: memref<1x8x32xf32, #tpu.memory_space<vmem>>, %arg3: memref<1x8x32xbf16, #tpu.memory_space<vmem>>, %arg4: memref<1x32xf32, #tpu.memory_space<vmem>>, %arg5: memref<1x32xf32, #tpu.memory_space<vmem>>, %arg6: memref<32x32xbf16, #tpu.memory_space<vmem>>, %arg7: memref<32x32xbf16, #tpu.memory_space<vmem>>, %arg8: memref<32x32xbf16, #tpu.memory_space<vmem>>, %arg9: memref<4x8x32xbf16, #tpu.memory_space<vmem>>, %arg10: memref<1x8x32xf32, #tpu.memory_space<vmem>>, %arg11: memref<4x8x8xbf16, #tpu.memory_space<vmem>>, %arg12: memref<4x8x8xbf16, #tpu.memory_space<vmem>>) attributes {dimension_semantics = [#tpu.dimension_semantics<parallel>, #tpu.dimension_semantics<arbitrary>], iteration_bounds = array<i64: 2, 1>, scalar_prefetch = 0 : i64, scratch_operands = 2 : i64, tpu.core_type = #tpu.core_type<tc>, window_params = [{transform_indices = @transform_0, window_bounds = array<i64: 1, 8, 32>}, {transform_indices = @transform_1, window_bounds = array<i64: 1, 8, 32>}, {pipeline_mode = #tpu.pipeline_mode<synchronous>, transform_indices = @transform_2, window_bounds = array<i64: 1, 32>}, {pipeline_mode = #tpu.pipeline_mode<synchronous>, transform_indices = @transform_3, window_bounds = array<i64: 1, 32>}, {pipeline_mode = #tpu.pipeline_mode<synchronous>, transform_indices = @transform_4, window_bounds = array<i64: 32, 32>}, {pipeline_mode = #tpu.pipeline_mode<synchronous>, transform_indices = @transform_5, window_bounds = array<i64: 32, 32>}, {pipeline_mode = #tpu.pipeline_mode<synchronous>, transform_indices = @transform_6, window_bounds = array<i64: 32, 32>}, {pipeline_mode = #tpu.pipeline_mode<synchronous>, transform_indices = @transform_7, window_bounds = array<i64: 4, 8, 32>}, {transform_indices = @transform_8, window_bounds = array<i64: 1, 8, 32>}]} {
    %c0_i32 = arith.constant 0 : i32
    %0 = arith.cmpi eq, %arg1, %c0_i32 : i32
    %1 = arith.extui %0 : i1 to i32
    %c0_i32_0 = arith.constant 0 : i32
    %2 = arith.cmpi ne, %1, %c0_i32_0 : i32
    scf.if %2 {
      %c0_32 = arith.constant 0 : index
      %c0_33 = arith.constant 0 : index
      %c0_34 = arith.constant 0 : index
      %57 = vector.load %arg3[%c0_32, %c0_33, %c0_34] : memref<1x8x32xbf16, #tpu.memory_space<vmem>>, vector<1x8x32xbf16>
      %58 = vector.shape_cast %57 : vector<1x8x32xbf16> to vector<8x32xbf16>
      %c0_35 = arith.constant 0 : index
      %c0_36 = arith.constant 0 : index
      %59 = vector.load %arg7[%c0_35, %c0_36] : memref<32x32xbf16, #tpu.memory_space<vmem>>, vector<32x32xbf16>
      %cst_37 = arith.constant dense<0.000000e+00> : vector<8x32xf32>
      %60 = tpu.matmul %58, %59, %cst_37 {dimension_numbers = #tpu.dot_dimension_numbers<[1], [0], [0], [1], [0, 0, 1, 1], [], []>} : vector<8x32xbf16>, vector<32x32xbf16>, vector<8x32xf32> -> vector<8x32xf32>
      %c0_38 = arith.constant 0 : index
      %c0_39 = arith.constant 0 : index
      %61 = vector.load %arg8[%c0_38, %c0_39] : memref<32x32xbf16, #tpu.memory_space<vmem>>, vector<32x32xbf16>
      %cst_40 = arith.constant dense<0.000000e+00> : vector<8x32xf32>
      %62 = tpu.matmul %58, %61, %cst_40 {dimension_numbers = #tpu.dot_dimension_numbers<[1], [0], [0], [1], [0, 0, 1, 1], [], []>} : vector<8x32xbf16>, vector<32x32xbf16>, vector<8x32xf32> -> vector<8x32xf32>
      %63 = arith.truncf %60 : vector<8x32xf32> to vector<8x32xbf16>
      %64 = vector.shape_cast %63 : vector<8x32xbf16> to vector<8x4x8xbf16>
      %65 = tpu.transpose %64, [1, 0, 2] : vector<8x4x8xbf16> -> vector<4x8x8xbf16>
      %c0_41 = arith.constant 0 : index
      %c0_42 = arith.constant 0 : index
      %c0_43 = arith.constant 0 : index
      %66 = vector.load %arg11[%c0_41, %c0_42, %c0_43] : memref<4x8x8xbf16, #tpu.memory_space<vmem>>, vector<4x8x8xbf16>
      tpu.vector_store %arg11[%c0_41, %c0_42, %c0_43], %65 {strides = array<i32>} : memref<4x8x8xbf16, #tpu.memory_space<vmem>>, vector<4x8x8xbf16>,
      %67 = arith.truncf %62 : vector<8x32xf32> to vector<8x32xbf16>
      %68 = vector.shape_cast %67 : vector<8x32xbf16> to vector<8x4x8xbf16>
      %69 = tpu.transpose %68, [1, 0, 2] : vector<8x4x8xbf16> -> vector<4x8x8xbf16>
      %c0_44 = arith.constant 0 : index
      %c0_45 = arith.constant 0 : index
      %c0_46 = arith.constant 0 : index
      %70 = vector.load %arg12[%c0_44, %c0_45, %c0_46] : memref<4x8x8xbf16, #tpu.memory_space<vmem>>, vector<4x8x8xbf16>
      tpu.vector_store %arg12[%c0_44, %c0_45, %c0_46], %69 {strides = array<i32>} : memref<4x8x8xbf16, #tpu.memory_space<vmem>>, vector<4x8x8xbf16>,
    } else {
    }
    %c0 = arith.constant 0 : index
    %c0_1 = arith.constant 0 : index
    %c0_2 = arith.constant 0 : index
    %3 = vector.load %arg2[%c0, %c0_1, %c0_2] : memref<1x8x32xf32, #tpu.memory_space<vmem>>, vector<1x8x32xf32>
    %4 = vector.shape_cast %3 : vector<1x8x32xf32> to vector<8x32xf32>
    %c0_3 = arith.constant 0 : index
    %c0_4 = arith.constant 0 : index
    %5 = vector.load %arg4[%c0_3, %c0_4] : memref<1x32xf32, #tpu.memory_space<vmem>>, vector<1x32xf32>
    %c0_5 = arith.constant 0 : index
    %c0_6 = arith.constant 0 : index
    %6 = vector.load %arg5[%c0_5, %c0_6] : memref<1x32xf32, #tpu.memory_space<vmem>>, vector<1x32xf32>
    %cst = arith.constant dense<0.000000e+00> : vector<8xf32>
    %7 = vector.multi_reduction <add>, %4, %cst [1] : vector<8x32xf32> to vector<8xf32>
    %8 = vector.shape_cast %7 : vector<8xf32> to vector<8x1xf32>
    %cst_7 = arith.constant 3.200000e+01 : f32
    %9 = vector.broadcast %cst_7 : f32 to vector<8x1xf32>
    %10 = arith.divf %8, %9 : vector<8x1xf32>
    %11 = vector.broadcast %10 : vector<8x1xf32> to vector<8x32xf32>
    %12 = arith.subf %4, %11 : vector<8x32xf32>
    %13 = arith.mulf %12, %12 : vector<8x32xf32>
    %cst_8 = arith.constant dense<0.000000e+00> : vector<8xf32>
    %14 = vector.multi_reduction <add>, %13, %cst_8 [1] : vector<8x32xf32> to vector<8xf32>
    %15 = vector.shape_cast %14 : vector<8xf32> to vector<8x1xf32>
    %cst_9 = arith.constant 3.200000e+01 : f32
    %16 = vector.broadcast %cst_9 : f32 to vector<8x1xf32>
    %17 = arith.divf %15, %16 : vector<8x1xf32>
    %18 = vector.broadcast %10 : vector<8x1xf32> to vector<8x32xf32>
    %19 = arith.subf %4, %18 : vector<8x32xf32>
    %cst_10 = arith.constant 9.99999974E-6 : f32
    %20 = vector.broadcast %cst_10 : f32 to vector<8x1xf32>
    %21 = arith.addf %17, %20 : vector<8x1xf32>
    %22 = math.rsqrt %21 : vector<8x1xf32>
    %23 = vector.broadcast %22 : vector<8x1xf32> to vector<8x32xf32>
    %24 = arith.mulf %19, %23 : vector<8x32xf32>
    %25 = vector.broadcast %5 : vector<1x32xf32> to vector<8x32xf32>
    %26 = arith.mulf %24, %25 : vector<8x32xf32>
    %27 = vector.broadcast %6 : vector<1x32xf32> to vector<8x32xf32>
    %28 = arith.addf %26, %27 : vector<8x32xf32>
    %29 = arith.truncf %28 : vector<8x32xf32> to vector<8x32xbf16>
    %c0_11 = arith.constant 0 : index
    %c0_12 = arith.constant 0 : index
    %30 = vector.load %arg6[%c0_11, %c0_12] : memref<32x32xbf16, #tpu.memory_space<vmem>>, vector<32x32xbf16>
    %cst_13 = arith.constant dense<0.000000e+00> : vector<8x32xf32>
    %31 = tpu.matmul %29, %30, %cst_13 {dimension_numbers = #tpu.dot_dimension_numbers<[1], [0], [0], [1], [0, 0, 1, 1], [], []>} : vector<8x32xbf16>, vector<32x32xbf16>, vector<8x32xf32> -> vector<8x32xf32>
    %32 = arith.truncf %31 : vector<8x32xf32> to vector<8x32xbf16>
    %33 = vector.shape_cast %32 : vector<8x32xbf16> to vector<8x4x8xbf16>
    %34 = tpu.transpose %33, [1, 0, 2] : vector<8x4x8xbf16> -> vector<4x8x8xbf16>
    %c0_14 = arith.constant 0 : index
    %c0_15 = arith.constant 0 : index
    %c0_16 = arith.constant 0 : index
    %35 = vector.load %arg11[%c0_14, %c0_15, %c0_16] : memref<4x8x8xbf16, #tpu.memory_space<vmem>>, vector<4x8x8xbf16>
    %c0_17 = arith.constant 0 : index
    %c0_18 = arith.constant 0 : index
    %c0_19 = arith.constant 0 : index
    %36 = vector.load %arg12[%c0_17, %c0_18, %c0_19] : memref<4x8x8xbf16, #tpu.memory_space<vmem>>, vector<4x8x8xbf16>
    %cst_20 = arith.constant dense<0.000000e+00> : vector<4x8x8xf32>
    %37 = tpu.matmul %34, %35, %cst_20 {dimension_numbers = #tpu.dot_dimension_numbers<[2], [2], [1], [1], [0, 0, 0, 1, 1, 1], [0], [0]>} : vector<4x8x8xbf16>, vector<4x8x8xbf16>, vector<4x8x8xf32> -> vector<4x8x8xf32>
    %cst_21 = arith.constant dense<0xFF800000> : vector<4x8xf32>
    %38 = vector.multi_reduction <maximumf>, %37, %cst_21 [2] : vector<4x8x8xf32> to vector<4x8xf32>
    %39 = vector.shape_cast %38 : vector<4x8xf32> to vector<4x8x1xf32>
    %40 = vector.broadcast %39 : vector<4x8x1xf32> to vector<4x8x8xf32>
    %41 = arith.subf %37, %40 : vector<4x8x8xf32>
    %42 = math.exp %41 : vector<4x8x8xf32>
    %cst_22 = arith.constant dense<0.000000e+00> : vector<4x8xf32>
    %43 = vector.multi_reduction <add>, %42, %cst_22 [2] : vector<4x8x8xf32> to vector<4x8xf32>
    %44 = vector.shape_cast %43 : vector<4x8xf32> to vector<4x8x1xf32>
    %45 = tpu.reciprocal %44 {approx = true} : vector<4x8x1xf32> -> vector<4x8x1xf32>
    %46 = vector.broadcast %45 : vector<4x8x1xf32> to vector<4x8x8xf32>
    %47 = arith.mulf %42, %46 : vector<4x8x8xf32>
    %48 = arith.truncf %47 : vector<4x8x8xf32> to vector<4x8x8xbf16>
    %cst_23 = arith.constant dense<0.000000e+00> : vector<4x8x8xf32>
    %49 = tpu.matmul %48, %36, %cst_23 {dimension_numbers = #tpu.dot_dimension_numbers<[2], [1], [1], [2], [0, 0, 0, 1, 1, 2], [0], [0]>} : vector<4x8x8xbf16>, vector<4x8x8xbf16>, vector<4x8x8xf32> -> vector<4x8x8xf32>
    %50 = arith.truncf %49 : vector<4x8x8xf32> to vector<4x8x8xbf16>
    %c0_24 = arith.constant 0 : index
    %c0_25 = arith.constant 0 : index
    %c0_26 = arith.constant 0 : index
    %51 = vector.load %arg9[%c0_24, %c0_25, %c0_26] : memref<4x8x32xbf16, #tpu.memory_space<vmem>>, vector<4x8x32xbf16>
    %cst_27 = arith.constant dense<0.000000e+00> : vector<4x8x32xf32>
    %52 = tpu.matmul %50, %51, %cst_27 {dimension_numbers = #tpu.dot_dimension_numbers<[2], [1], [1], [2], [0, 0, 0, 1, 1, 2], [0], [0]>} : vector<4x8x8xbf16>, vector<4x8x32xbf16>, vector<4x8x32xf32> -> vector<4x8x32xf32>
    %cst_28 = arith.constant dense<0.000000e+00> : vector<8x32xf32>
    %53 = vector.multi_reduction <add>, %52, %cst_28 [0] : vector<4x8x32xf32> to vector<8x32xf32>
    %c0_29 = arith.constant 0 : index
    %c0_30 = arith.constant 0 : index
    %c0_31 = arith.constant 0 : index
    %54 = vector.load %arg10[%c0_29, %c0_30, %c0_31] : memref<1x8x32xf32, #tpu.memory_space<vmem>>, vector<1x8x32xf32>
    %55 = vector.shape_cast %54 : vector<1x8x32xf32> to vector<8x32xf32>
    %56 = vector.shape_cast %53 : vector<8x32xf32> to vector<1x8x32xf32>
    tpu.vector_store %arg10[%c0_29, %c0_30, %c0_31], %56 {strides = array<i32>} : memref<1x8x32xf32, #tpu.memory_space<vmem>>, vector<1x8x32xf32>,
    return
  }
  func.func @transform_0(%arg0: i32, %arg1: i32) -> (i32, i32, i32) {
    %c0_i32 = arith.constant 0 : i32
    %c0_i32_0 = arith.constant 0 : i32
    return %arg0, %arg1, %c0_i32 : i32, i32, i32
  }
  func.func @transform_1(%arg0: i32, %arg1: i32) -> (i32, i32, i32) {
    %c0_i32 = arith.constant 0 : i32
    %c0_i32_0 = arith.constant 0 : i32
    %c0_i32_1 = arith.constant 0 : i32
    return %arg0, %c0_i32, %c0_i32_0 : i32, i32, i32
  }
  func.func @transform_2(%arg0: i32, %arg1: i32) -> (i32, i32) {
    %c0_i32 = arith.constant 0 : i32
    %c0_i32_0 = arith.constant 0 : i32
    %c0_i32_1 = arith.constant 0 : i32
    return %c0_i32, %c0_i32_0 : i32, i32
  }
  func.func @transform_3(%arg0: i32, %arg1: i32) -> (i32, i32) {
    %c0_i32 = arith.constant 0 : i32
    %c0_i32_0 = arith.constant 0 : i32
    %c0_i32_1 = arith.constant 0 : i32
    return %c0_i32, %c0_i32_0 : i32, i32
  }
  func.func @transform_4(%arg0: i32, %arg1: i32) -> (i32, i32) {
    %c0_i32 = arith.constant 0 : i32
    %c0_i32_0 = arith.constant 0 : i32
    %c0_i32_1 = arith.constant 0 : i32
    return %c0_i32, %c0_i32_0 : i32, i32
  }
  func.func @transform_5(%arg0: i32, %arg1: i32) -> (i32, i32) {
    %c0_i32 = arith.constant 0 : i32
    %c0_i32_0 = arith.constant 0 : i32
    %c0_i32_1 = arith.constant 0 : i32
    return %c0_i32, %c0_i32_0 : i32, i32
  }
  func.func @transform_6(%arg0: i32, %arg1: i32) -> (i32, i32) {
    %c0_i32 = arith.constant 0 : i32
    %c0_i32_0 = arith.constant 0 : i32
    %c0_i32_1 = arith.constant 0 : i32
    return %c0_i32, %c0_i32_0 : i32, i32
  }
  func.func @transform_7(%arg0: i32, %arg1: i32) -> (i32, i32, i32) {
    %c0_i32 = arith.constant 0 : i32
    %c0_i32_0 = arith.constant 0 : i32
    %c0_i32_1 = arith.constant 0 : i32
    %c0_i32_2 = arith.constant 0 : i32
    return %c0_i32, %c0_i32_0, %c0_i32_1 : i32, i32, i32
  }
  func.func @transform_8(%arg0: i32, %arg1: i32) -> (i32, i32, i32) {
    %c0_i32 = arith.constant 0 : i32
    %c0_i32_0 = arith.constant 0 : i32
    return %arg0, %arg1, %c0_i32 : i32, i32, i32
  }
}

</mosaic_0001>

<bundles_post_ra>
// kernel: tpu_custom_call.1
= control target key start
LH: loop header
LB: loop body
LE: loop exit
PB: predicated region body
PF: predicated region fallthrough
CT: control target
= control target key end

     0   :  { %s3067_s0 = inlined_call_operand.hbm [shape: f32[2,8,32], index: 0, kind: input, shape index: {}]   ;;  %s3068_s1 = inlined_call_operand.hbm [shape: bf16[2,8,32], index: 1, kind: input, shape index: {}]   ;;  %s3069_s2 = inlined_call_operand.vmem [shape: f32[1,32], index: 2, kind: input, shape index: {}]   ;;  %s3070_s3 = inlined_call_operand.vmem [shape: f32[1,32], index: 3, kind: input, shape index: {}]   ;;  %s3071_s4 = inlined_call_operand.hbm [shape: bf16[32,32], index: 4, kind: input, shape index: {}]   ;;  %s3072_s5 = inlined_call_operand.vmem [shape: bf16[32,32], index: 5, kind: input, shape index: {}]   ;;  %s3073_s6 = inlined_call_operand.hbm [shape: bf16[32,32], index: 6, kind: input, shape index: {}]   ;;  %s3074_s7 = inlined_call_operand.hbm [shape: bf16[4,8,32], index: 7, kind: input, shape index: {}]   ;;  %s3075_s8 = inlined_call_operand.hbm [shape: f32[2,8,32], index: 8, kind: output, shape index: {}]  }
   0x1   :  { %3083 = sst [smem:[#allocation22_spill]] %s3067_s0 }
   0x2   :  { %3084 = sst [smem:[#allocation23_spill]] %s3071_s4 }
   0x3   :  { %3085 = sst [smem:[#allocation24_spill]] %s3075_s8 }
   0x4   :  { %13 = vsyncpa [#allocation5], 0 }
   0x5   :  { %15 = vsyncpa [#allocation5 + $0x1], 0 }
   0x6   :  { %16 = vsyncpa [#allocation8], 0 }
   0x7   :  { %18 = vsyncpa [#allocation8 + $0x1], 0 }
   0x8   :  { %19 = vsyncpa [#allocation11], 0 }
   0x9   :  { %20 = vsyncpa [#allocation6], 0 }
   0xa   :  { %22 = vsyncpa [#allocation6 + $0x1], 0  ;;  %s2535_s27 = smov 0   ;;  %s2537_s28 = smov 0  }
   0xb   :  { %s2539_s29 = smov 0   ;;  %s2541_s30 = smov 0  }
   0xc   :  { %s2543_s9 = smov 0   ;;  %s2545_s10 = smov 0  }
   0xd LB: > { %3086 = sst [smem:[#allocation19_spill]] %s2452_s27  ;;  %s2566_s11 = sadd.s32 4294967295, %s2472_s10   ;;  %s2472_s10 = sphi %s2545_s10, %s28_s10   ;;  %s2468_s9 = sphi %s2543_s9, %s3117_s9   ;;  %s2464_s30 = sphi %s2541_s30, %s3116_s30   ;;  %s2460_s29 = sphi %s2539_s29, %s3115_s29   ;;  %s2456_s28 = sphi %s2537_s28, %s3114_s28   ;;  %s2452_s27 = sphi %s2535_s27, %s3113_s27  }
   0xe   : > { %3087 = sst [smem:[#allocation20_spill]] %s2464_s30  ;;  %s1929_s12 = sadd.s32 4294967294, %s2472_s10  }
   0xf   : > { %p62_p0 = scmp.ne.s32.totalorder %s2456_s28, %s2452_s27  ;;  %p3076_p1 = scmp.eq.s32.totalorder %s2566_s11, 0 }
  0x10   : > { %p246_p3 = scmp.eq.s32.totalorder %s1929_s12, 1  ;;  %p1930_p5 = scmp.ge.s32.totalorder %s2472_s10, 1 }
  0x11   : > { %p2575_p4 = por %p3076_p1, %p62_p0  ;;  %p253_p7 = scmp.lt.s32.totalorder %s2472_s10, 3 }
  0x12   : > { %p2580_p6 = por %p246_p3, %p62_p0  ;;  %s2474_s16 = smov [#allocation9]  }
  0x13   : > { %s3088_s13 = scalar_select %p2575_p4, 1, 0 }
  0x14   : > { %s3089_s14 = scalar_select %p2580_p6, 1, 0 }
  0x15   : > { %p2585_p8 = pnand %p1930_p5, %p253_p7  ;;  %s271_s17 = sshll.u32 %s2474_s16, 4  ;;  %s2589_s17 = int_to_ptr.vmem [resolvable:$true] %s271_s17 }
  0x16   : > { %3090 = sst [smem:[#allocation21_spill]] %s3089_s14  ;;  %s2475_s19 = smov [#allocation10]  }
  0x17   : > { %s3091_s15 = scalar_select %p2585_p8, 1, 0 }
  0x18   : > { %p2120_p9 = pneg %p2585_p8  ;;  %s287_s20 = sshll.u32 %s2475_s19, 4  ;;  %s2600_s20 = int_to_ptr.vmem [resolvable:$true] %s287_s20 }
  0x19   : > { %s2476_s21 = smov [#allocation12]   ;;  %s3093_s4 = sld [smem:[#allocation23_spill]] }
  0x1a   : > { %p2596_p11 = pnand %p2120_p9, %p3076_p1  ;;  %s2602_s22 = sshll.u32 %s2476_s21, 4  ;;  %s301_s22 = int_to_ptr.vmem [resolvable:$true] %s2602_s22 }
  0x1c   : > { %p2612_p13 = pneg %p2596_p11 }
  0x1f   : > { %s2234_s25 = scalar_lea.hbm %s3093_s4, 256 }
  0x20   : > { %p2235_p12 = scmp.ne.s32.totalorder %s3093_s4, %s2234_s25  ;;  %p2241_p5 = scmp.lt.u32.totalorder %s2234_s25, %s3093_s4 }
  0x22   : > { %p2237_p0 = pnand %p2612_p13, %p2235_p12 }
  0x24   : > { %p2238_p3 = pneg %p2237_p0 }
  0x26   : > { %p2243_p7 = pnand %p2241_p5, %p2238_p3 }
  0x28   : > { %2246 = shalt.err (!%p2243_p7)
}
  0x29   : > { %s2247_s23 = scalar_lea.vmem %s2589_s17, 256  ;;  %p2255_p2 = scmp.lt.s32.totalorder %s2589_s17, %s2589_s17 }
  0x2a   : > { %p2248_p9 = scmp.ne.s32.totalorder %s2589_s17, %s2247_s23  ;;  %p2256_p6 = scmp.lt.s32.totalorder %s2247_s23, %s2247_s23 }
  0x2c   : > { %p2250_p10 = pnand %p2248_p9, %p2612_p13  ;;  %p2257_p12 = por %p2256_p6, %p2255_p2 }
  0x2e   : > { %p2251_p1 = pneg %p2250_p10 }
  0x30   : > { %p2258_p0 = pnand %p2257_p12, %p2251_p1 }
  0x32   : > { %2261 = shalt.err (!%p2258_p0)
}
  0x33   : > { %s2477_s24 = smov 64   ;;  %s2478_s25 = smov 4  }
  0x34   : > { %2123 = dma.hbm_to_vmem [thread:$0]  (!%p2596_p11), %s3093_s4, 256, %s2589_s17, [#allocation8], %s2477_s24, %s2477_s24, %s2478_s25  }
  0x35   : > { %s2262_s23 = scalar_lea.hbm %s3073_s6, 256 }
  0x36   : > { %p2263_p1 = scmp.ne.s32.totalorder %s3073_s6, %s2262_s23  ;;  %p2269_p10 = scmp.lt.u32.totalorder %s2262_s23, %s3073_s6 }
  0x38   : > { %p2265_p2 = pnand %p2263_p1, %p2612_p13 }
  0x3a   : > { %p2266_p6 = pneg %p2265_p2 }
  0x3c   : > { %p2271_p3 = pnand %p2269_p10, %p2266_p6 }
  0x3e   : > { %2274 = shalt.err (!%p2271_p3)
}
  0x3f   : > { %s2275_s17 = scalar_lea.vmem %s2600_s20, 256  ;;  %p2283_p12 = scmp.lt.s32.totalorder %s2600_s20, %s2600_s20 }
  0x40   : > { %p2276_p5 = scmp.ne.s32.totalorder %s2600_s20, %s2275_s17  ;;  %p2284_p0 = scmp.lt.s32.totalorder %s2275_s17, %s2275_s17 }
  0x42   : > { %p2278_p7 = pnand %p2276_p5, %p2612_p13  ;;  %p2285_p1 = por %p2284_p0, %p2283_p12 }
  0x44   : > { %p2279_p9 = pneg %p2278_p7 }
  0x46   : > { %p2286_p2 = pnand %p2285_p1, %p2279_p9 }
  0x48   : > { %2289 = shalt.err (!%p2286_p2)
}
  0x49   : > { %2126 = dma.hbm_to_vmem [thread:$0]  (!%p2596_p11), %s3073_s6, 256, %s2600_s20, [#allocation11], %s2477_s24, %s2477_s24, %s2478_s25  }
  0x4a   : > { %s2290_s26 = scalar_lea.hbm %s3074_s7, 256 }
  0x4b   : > { %p2291_p6 = scmp.ne.s32.totalorder %s3074_s7, %s2290_s26  ;;  %p2297_p5 = scmp.lt.u32.totalorder %s2290_s26, %s3074_s7 }
  0x4d   : > { %p2293_p10 = pnand %p2291_p6, %p2612_p13 }
  0x4f   : > { %p2294_p3 = pneg %p2293_p10 }
  0x51   : > { %p2299_p7 = pnand %p2297_p5, %p2294_p3 }
  0x53   : > { %2302 = shalt.err (!%p2299_p7)
}
  0x54   : > { %s2303_s17 = scalar_lea.vmem %s301_s22, 256  ;;  %p2311_p1 = scmp.lt.s32.totalorder %s301_s22, %s301_s22 }
  0x55   : > { %p2304_p9 = scmp.ne.s32.totalorder %s301_s22, %s2303_s17  ;;  %p2312_p2 = scmp.lt.s32.totalorder %s2303_s17, %s2303_s17 }
  0x57   : > { %p2306_p12 = pnand %p2304_p9, %p2612_p13  ;;  %p2313_p4 = por %p2312_p2, %p2311_p1 }
  0x59   : > { %p2307_p0 = pneg %p2306_p12 }
  0x5b   : > { %p2314_p8 = pnand %p2313_p4, %p2307_p0 }
  0x5d   : > { %2317 = shalt.err (!%p2314_p8)
}
  0x5e   : > { %2129 = dma.hbm_to_vmem [thread:$0]  (!%p2596_p11), %s3074_s7, 256, %s301_s22, [#allocation11], %s2477_s24, %s2477_s24, %s2478_s25  }
  0x5f   : > { %s49_s16 = sadd.s32 1, %s2460_s29  ;;  %s40_s18 = sadd.s32 1, %s2468_s9 }
  0x60   : > { %p56_p4 = scmp.ne.s32.totalorder %s2460_s29, %s2456_s28  ;;  %p42_p8 = scmp.ge.s32.totalorder %s40_s18, 2 }
  0x61   : > { %p57_p13 = scmp.eq.s32.totalorder %s2472_s10, 0  ;;  %p3095_p6 = scmp.eq.s32.totalorder %s2566_s11, 1 }
  0x62   : > { %p2144_p3 = scmp.lt.s32.totalorder %s2472_s10, 2  ;;  %s3119_s18 = smov (%p42_p8, %s40_s18), 0 }
  0x63   : > { %p2691_p10 = por %p3095_p6, %p56_p4  ;;  %p58_p5 = por %p57_p13, %p56_p4 }
  0x64   : > { %s2699_s30 = sand.u32 1, %s2460_s29   ;;  %s44_s22 = ssub.s32 %s2468_s9, %s3119_s18 }
  0x65   : > { %s3096_s27 = scalar_select %p2691_p10, 1, 0 }
  0x66   : > { %p47_p11 = scmp.eq.s32.totalorder %s44_s22, 0  ;;  %s1935_s24 = sshll.u32 %s2699_s30, 3 }
  0x67   : > { %s1936_s25 = sshll.u32 %s2468_s9, 7  ;;  %s3097_s0 = sld [smem:[#allocation22_spill]] }
  0x68   : > { %s2706_s14 = scalar_select %p47_p11, %s2460_s29, %s49_s16  }
  0x69   : > { %s318_s21 = scalar_lea.vmem [#allocation4], %s1935_s24  ;;  %p2717_p7 = pnand %p2144_p3, %p58_p5 }
  0x6a   : > { %s326_s23 = sshll.u32 %s318_s21, 4  ;;  %s1937_s8 = sshll.u32 %s2699_s30, 2  ;;  %s2713_s23 = int_to_ptr.vmem [resolvable:$true] %s326_s23 }
  0x6b   : > { %s315_s16 = scalar_lea.sflag [#allocation5], %s2699_s30  ;;  %p2320_p12 = pneg %p2717_p7 }
  0x6d   : > { %s2711_s19 = scalar_lea.hbm %s3097_s0, %s1936_s25  ;;  %s2323_s26 = scalar_lea.hbm %s3097_s0, 256 }
  0x6e   : > { %s2318_s22 = scalar_lea.hbm %s2711_s19, 128  ;;  %p2324_p2 = scmp.lt.u32.totalorder %s2711_s19, %s3097_s0 }
  0x6f   : > { %p2319_p9 = scmp.ne.s32.totalorder %s2711_s19, %s2318_s22  ;;  %p2325_p4 = scmp.lt.u32.totalorder %s2323_s26, %s2318_s22 }
  0x70   : > { %p2327_p13 = scmp.lt.u32.totalorder %s2318_s22, %s2711_s19 }
  0x71   : > { %p2321_p0 = pnand %p2320_p12, %p2319_p9  ;;  %p2326_p8 = por %p2325_p4, %p2324_p2 }
  0x73   : > { %p2322_p1 = pneg %p2321_p0  ;;  %p2328_p6 = por %p2327_p13, %p2326_p8 }
  0x75   : > { %p2329_p3 = pnand %p2328_p6, %p2322_p1 }
  0x77   : > { %2332 = shalt.err (!%p2329_p3)
}
  0x78   : > { %s2333_s20 = scalar_lea.vmem %s2713_s23, 128  ;;  %s2479_s24 = smov [#allocation4]  }
  0x79   : > { %p2334_p5 = scmp.ne.s32.totalorder %s2713_s23, %s2333_s20  ;;  %s2338_s25 = sshll.u32 %s2479_s24, 4  ;;  %s2339_s25 = int_to_ptr.vmem [resolvable:$false] %s2338_s25 }
  0x7a   : > { %s2340_s12 = scalar_lea.vmem %s2339_s25, 256  ;;  %p2341_p0 = scmp.lt.s32.totalorder %s2713_s23, %s2339_s25 }
  0x7b   : > { %p2336_p11 = pnand %p2334_p5, %p2320_p12  ;;  %p2342_p2 = scmp.lt.s32.totalorder %s2340_s12, %s2333_s20 }
  0x7d   : > { %p2337_p9 = pneg %p2336_p11  ;;  %p2343_p4 = por %p2342_p2, %p2341_p0 }
  0x7f   : > { %p2344_p8 = pnand %p2343_p4, %p2337_p9 }
  0x81   : > { %2347 = shalt.err (!%p2344_p8)
}
  0x82   : > { %2133 = dma.hbm_to_vmem [thread:$0]  (!%p2717_p7), %s2711_s19, 128, %s2713_s23, %s315_s16  }
  0x83   : > { %s1938_s22 = sshll.u32 %s2468_s9, 6  ;;  %s337_s20 = scalar_lea.vmem [#allocation7], %s1937_s8 }
  0x84   : > { %s2753_s24 = scalar_lea.hbm %s3068_s1, %s1938_s22  ;;  %s344_s25 = sshll.u32 %s337_s20, 4  ;;  %s345_s25 = int_to_ptr.vmem [resolvable:$true] %s344_s25 }
  0x85   : > { %s3099_s12 = sand.u32 1, %s2472_s10   ;;  %s2348_s4 = scalar_lea.hbm %s2753_s24, 64 }
  0x86   : > { %s334_s0 = scalar_lea.sflag [#allocation8], %s3099_s12  ;;  %p2349_p1 = scmp.ne.s32.totalorder %s2753_s24, %s2348_s4 }
  0x87   : > { %s2353_s16 = scalar_lea.hbm %s3068_s1, 128  ;;  %p2354_p3 = scmp.lt.u32.totalorder %s2753_s24, %s3068_s1 }
  0x88   : > { %p2351_p13 = pnand %p2349_p1, %p2320_p12  ;;  %p2355_p5 = scmp.lt.u32.totalorder %s2353_s16, %s2348_s4 }
  0x89   : > { %p2357_p9 = scmp.lt.u32.totalorder %s2348_s4, %s2753_s24 }
  0x8a   : > { %p2352_p6 = pneg %p2351_p13  ;;  %p2356_p11 = por %p2355_p5, %p2354_p3 }
  0x8c   : > { %p2358_p0 = por %p2357_p9, %p2356_p11 }
  0x8e   : > { %p2359_p2 = pnand %p2358_p0, %p2352_p6 }
  0x90   : > { %2362 = shalt.err (!%p2359_p2)
}
  0x91   : > { %s2363_s8 = scalar_lea.vmem %s345_s25, 64  ;;  %s2480_s26 = smov [#allocation7]  }
  0x92   : > { %p2364_p4 = scmp.ne.s32.totalorder %s345_s25, %s2363_s8  ;;  %s2368_s21 = sshll.u32 %s2480_s26, 4  ;;  %s2369_s21 = int_to_ptr.vmem [resolvable:$false] %s2368_s21 }
  0x93   : > { %s2370_s20 = scalar_lea.vmem %s2369_s21, 128  ;;  %p2371_p13 = scmp.lt.s32.totalorder %s345_s25, %s2369_s21 }
  0x94   : > { %p2366_p8 = pnand %p2364_p4, %p2320_p12  ;;  %p2372_p10 = scmp.lt.s32.totalorder %s2370_s20, %s2363_s8 }
  0x96   : > { %p2367_p1 = pneg %p2366_p8  ;;  %p2373_p3 = por %p2372_p10, %p2371_p13 }
  0x98   : > { %p2374_p5 = pnand %p2373_p3, %p2367_p1 }
  0x9a   : > { %2377 = shalt.err (!%p2374_p5)
}
  0x9b   : > { %2136 = dma.hbm_to_vmem [thread:$0]  (!%p2717_p7), %s2753_s24, 64, %s345_s25, %s334_s0  }
  0x9c   : > { %p3100_p6 = scmp.ne.s32.totalorder %s3091_s15, 0 }
  0x9d   : > { %s2781_s4 = sand.u32 (!%p3100_p6), 1, %s2456_s28   ;;  %p3101_p10 = scmp.ne.s32.totalorder (!%p3100_p6), %s3088_s13, 0 }
  0x9e   : > { %353 = sbr.rel (%p3100_p6) target bundleno = 1834 (0x72a), region = 52  ;;  %s1940_s12 = sshll.u32 (!%p3100_p6), %s2781_s4, 3 }
  0x9f   : > { %s356_s19 = scalar_lea.sflag (!%p3100_p6), [#allocation5], %s2781_s4  ;;  %s359_s23 = scalar_lea.vmem (!%p3100_p6), [#allocation4], %s1940_s12 }
  0xa5   : > { %2431 = dma.done.wait (%p3101_p10), %s356_s19, 128  }
  0xa6   : > { %2433 = vsyncadd (%p3101_p10), %s356_s19, 4294967168  ;;  %s364_s0 = sand.u32 1, %s2566_s11   ;;  %s1941_s15 = sshll.u32 %s2781_s4, 2 }
  0xa7   : > { %s365_s17 = scalar_lea.sflag [#allocation8], %s364_s0  ;;  %s368_s24 = scalar_lea.vmem [#allocation7], %s1941_s15 }
  0xa8   : > { %2435 = dma.done.wait (%p3101_p10), %s365_s17, 64  }
  0xa9   : > { %2437 = vsyncadd (%p3101_p10), %s365_s17, 4294967232  ;;  %p3102_p7 = scmp.eq.s32.totalorder %s2566_s11, 0 }
  0xab   : > { %2439 = dma.done.wait (%p3102_p7), [#allocation8], 256   ;;  %p3103_p12 = pmov %p3102_p7 }
  0xac   : > { %p3104_p11 = pmov %p3102_p7 }
  0xad   : > { %2441 = vsyncadd (%p3103_p12), [#allocation8], 4294967040 }
  0xae   : > { %2443 = dma.done.wait (%p3104_p11), [#allocation11], 512   ;;  %p3105_p9 = pmov %p3102_p7 }
  0xaf   : > { %vm440_vm0 = vcmask 261120   ;;  %v895_v0 = vld [vmem:[%s359_s23] sm:$0xff]  ;;  %v2481_v3 = vmov 0.0   ;;  %vm2482_vm1 = vmmov 0   ;;  %v2819_v5 = vld [vmem:[%s368_s24] sm:$0xf]  ;;  %v551_v30 = vlaneseq }
  0xb0   : > { %2445 = vsyncadd (%p3105_p9), [#allocation11], 4294966784  ;;  %v899_v1 = vsel %vm440_vm0, %v895_v0, 0.0  ;;  %v2210_v2 = vld [vmem:[%s3072_s5] sm:$0xff]   ;;  %2006 = vmatprep.subr.bf16.mxu0 %v2481_v3  ;;  %2010 = vmatprep.mubr.msk.bf16.mxu0 %vm2482_vm1, %v2481_v3  ;;  %v2211_v4 = vld [vmem:[%s3072_s5 + $0x8] sm:$0xff]   ;;  %s2483_s30 = smov 120  }
  0xb1   : > { %900 = vadd.xlane.f32.xlu0 %v899_v1  ;;  %2007 = vmatpush3.bf16.msra.mxu0 %v2210_v2  ;;  %v2212_v11 = vld [vmem:[#allocation9] sm:$0xff]   ;;  %v2213_v12 = vld [vmem:[#allocation9 + $0x8] sm:$0xff]   ;;  %s2484_s22 = smov 104   ;;  %s2485_s8 = smov 112   ;;  %v2486_v28 = vmov 1983009808  }
  0xb2   : > { %2014 = vmatprep.subr.bf16.mxu1 %v2481_v3  ;;  %2008 = vmatprep.subr.bf16.mxu0 %v2481_v3  ;;  %v1952_v22 = vld [vmem:[%s3069_s2] ss:$0 sm:$0xff]  ;;  %v549_v29 = vunpack.c.l.s4 %v2486_v28  ;;  %v552_v32 = vshrl.u32 %v551_v30, 7  ;;  %v2487_v33 = vmov 1934713408   ;;  %v2488_v49 = vmov 0  }
  0xb3   : > { %2018 = vmatprep.mubr.msk.bf16.mxu1 %vm2482_vm1, %v2481_v3  ;;  %v1953_v24 = vld [vmem:[%s3070_s3] ss:$0 sm:$0xff]  ;;  %v566_v34 = vunpack.c.l.s4 %v2487_v33  ;;  %vm713_vm2 = vcmask 60416   ;;  %vm1164_vm3 = vcmask 64512   ;;  %vm1400_vm4 = vcmask 1043456   ;;  %s3106_s23 = sld [smem:[#allocation20_spill]] }
  0xb4   : > { %v550_v31 = vunpack.c.0.s8 %v549_v29  ;;  %s417_s15 = scalar_lea.vmem [#allocation13], %s1940_s12  ;;  %s3107_s13 = sld [smem:[#allocation24_spill]] }
  0xb5   : > { %2009 = vmatpush3.bf16.msra.mxu0 %v2211_v4  ;;  %v567_v36 = vunpack.c.0.s8 %v566_v34  ;;  %v2214_v34 = vld [vmem:[#allocation10] sm:$0xff]   ;;  %s1797_s17 = sshll.u32 %s417_s15, 4  ;;  %s1783_s12 = scalar_lea.sflag [#allocation6], %s2781_s4  ;;  %s3019_s17 = int_to_ptr.vmem [resolvable:$true] %s1797_s17 }
  0xb6   : > { %2022 = vmatprep.subr.bf16.mxu0 %v2481_v3  ;;  %v2841_v35 = vsub.s32 %v550_v31, %v552_v32  ;;  %2015 = vmatpush3.bf16.msra.mxu1 %v2214_v34  ;;  %s2378_s11 = scalar_lea.vmem %s3019_s17, 128  ;;  %p3108_p2 = scmp.ne.s32.totalorder %s3096_s27, 0 }
  0xb7   : > { %v2844_v40 = vsub.s32 %v567_v36, %v552_v32  ;;  %2016 = vmatprep.subr.bf16.mxu1 %v2481_v3  ;;  %v2215_v36 = vld [vmem:[#allocation10 + $0x8] sm:$0xff]   ;;  %p2379_p0 = scmp.ne.s32.totalorder %s3019_s17, %s2378_s11 }
  0xb8   : > { %2011 = vmatmul.mubr.msk.bf16.vlgmr.msra.gmra.mrb[0].mxu0 %vm440_vm0, %v2819_v5 }
  0xb9   : > { %2026 = vmatprep.mubr.msk.bf16.mxu0 %vm2482_vm1, %v2481_v3  ;;  %2023 = vmatpush3.bf16.msra.mxu0 %v2212_v11  ;;  %s1970_s0 = sshll.u32 %s3106_s23, 7  ;;  %p2380_p4 = pnand %p2379_p0, %p3108_p2 }
  0xba   : > { %2024 = vmatprep.subr.bf16.mxu0 %v2481_v3  ;;  %2017 = vmatpush3.bf16.msra.mxu1 %v2215_v36  ;;  %s3017_s16 = scalar_lea.hbm %s3107_s13, %s1970_s0 }
  0xbb   : > { %2030 = vmatprep.subr.bf16.mxu1 %v2481_v3  ;;  %p2381_p8 = pneg %p2380_p4 }
  0xbd   : > { %2025 = vmatpush3.bf16.msra.mxu0 %v2213_v12  ;;  %2019 = vmatmul.mubr.msk.bf16.vlgmr.msra.gmra.mrb[0].mxu1 %vm440_vm0, %v2819_v5 }
  0xbe   : > { %2036 = vmatprep.subr.bf16.mxu0 %v2481_v3  ;;  %2032 = vmatprep.mubr.msk.bf16.mxu1 %vm2482_vm1, %v2481_v3 }
 0x13e   : > { %v901_v6 = vpop.xlane.xlu0 %900 }
 0x13f   : > { %v903_v7 = vmul.f32 0.03125, %v901_v6 }
 0x141   : > { %v904_v8 = vsub.f32 %v895_v0, %v903_v7 }
 0x143   : > { %v905_v9 = vmul.f32 %v904_v8, %v904_v8 }
 0x145   : > { %v906_v10 = vsel %vm440_vm0, %v905_v9, 0.0 }
 0x146   : > { %907 = vadd.xlane.f32.xlu0 %v906_v10 }
 0x18b   : > { %v478_v13 = vpop.f32.mrb[0].mxu0 }
 0x18c   : > { %v540_v14 = vpack.c.bf16 %v478_v13, %v478_v13  ;;  %v2012_v15 = vpop.f32.mrb[1].mxu0 }
 0x18d   : > { %v481_v16 = vpop.f32.mrb[2].mxu0 }
 0x18e   : > { %542 = vrot.lane.b32.xlu1 %v540_v14, %s2483_s30  ;;  %546 = vrot.lane.b32.xlu0 %v540_v14, %s2484_s22  ;;  %v2013_v17 = vpop.f32.mrb[3].mxu0  ;;  %v554_v45 = vrot.slane %v540_v14, %v2841_v35 }
 0x192   : > { %544 = vrot.lane.b32.xlu1 %v540_v14, %s2485_s8 }
 0x1d3   : > { %v908_v18 = vpop.xlane.xlu0 %907 }
 0x1d4   : > { %v909_v19 = vmul.f32 0.03125, %v908_v18 }
 0x1d6   : > { %v910_v20 = vadd.f32 1e-05, %v909_v19 }
 0x1d8   : > { %2216 = vrsqrt.f32 %v910_v20 }
 0x1e2   : > { %v2217_v21 = vpop.eup %2216 }
 0x1e3   : > { %v912_v23 = vmul.f32 %v2217_v21, %v904_v8 }
 0x1e5   : > { %v919_v25 = vmul.f32 %v1952_v22, %v912_v23 }
 0x1e7   : > { %v926_v26 = vadd.f32 %v1953_v24, %v919_v25 }
 0x1e9   : > { %v927_v27 = vpack.c.bf16 %v926_v26, %v926_v26 }
 0x1eb   : > { %2027 = vmatmul.mubr.msk.bf16.vlgmr.msra.gmra.mrb[4].mxu0 %vm440_vm0, %v927_v27 }
 0x1ec   : > { %2038 = vmatprep.mubr.msk.bf16.mxu0 %vm2482_vm1, %v2481_v3 }
 0x200   : > { %v543_v37 = vpop.permute.xlu1 %542  ;;  %v547_v38 = vpop.permute.xlu0 %546 }
 0x201   : > { %v588_v39 = vrot.slane %v543_v37, %v2841_v35  ;;  %v596_v41 = vrot.slane %v547_v38, %v2841_v35 }
 0x203   : > { %v597_v42 = vcombine.low %v588_v39, %v596_v41  ;;  %v598_v43 = vcombine.high %v588_v39, %v596_v41 }
 0x204   : > { %v545_v44 = vpop.permute.xlu1 %544 }
 0x205   : > { %v605_v46 = vrot.slane %v597_v42, %v2844_v40  ;;  %v612_v47 = vrot.slane %v598_v43, %v2844_v40  ;;  %v562_v48 = vrot.slane %v545_v44, %v2841_v35 }
 0x207   : > { %v613_v50 = vcombine.high %v605_v46, %v2488_v49  ;;  %v563_v51 = vcombine.low %v554_v45, %v562_v48  ;;  %v564_v52 = vcombine.high %v554_v45, %v562_v48  ;;  %v614_v53 = vcombine.high %v612_v47, %v2488_v49 }
 0x208   : > { %v620_v54 = vshrl.u32 %v605_v46, 16  ;;  %v636_v58 = vshrl.u32 %v612_v47, 16 }
 0x209   : > { %v571_v55 = vrot.slane %v563_v51, %v2844_v40  ;;  %v578_v56 = vrot.slane %v564_v52, %v2844_v40  ;;  %v628_v57 = vshrl.u32 %v613_v50, 16  ;;  %v644_v63 = vshrl.u32 %v614_v53, 16 }
 0x20b   : > { %v579_v59 = vcombine.high %v571_v55, %v2488_v49  ;;  %v580_v60 = vcombine.high %v578_v56, %v2488_v49  ;;  %v617_v61 = vpack.i.b16 %v605_v46, %v571_v55  ;;  %v619_v62 = vshrl.u32 %v571_v55, 16  ;;  %v2882_v46 = vpop.f32.mrb[0].mxu1 }
 0x20c   : > { %v633_v0 = vpack.i.b16 %v612_v47, %v578_v56  ;;  %v635_v1 = vshrl.u32 %v578_v56, 16  ;;  %v2020_v47 = vpop.f32.mrb[1].mxu1 }
 0x20d   : > { %v621_v2 = vpack.i.b16 %v620_v54, %v619_v62  ;;  %v625_v4 = vpack.i.b16 %v613_v50, %v579_v59  ;;  %v627_v6 = vshrl.u32 %v579_v59, 16  ;;  %v641_v7 = vpack.i.b16 %v614_v53, %v580_v60  ;;  %v537_v48 = vpop.f32.mrb[2].mxu1 }
 0x20e   : > { %v637_v8 = vpack.i.b16 %v636_v58, %v635_v1  ;;  %v643_v9 = vshrl.u32 %v580_v60, 16  ;;  %v647_v10 = vcombine.low %v617_v61, %v633_v0  ;;  %v2021_v50 = vpop.f32.mrb[3].mxu1 }
 0x20f   : > { %v629_v11 = vpack.i.b16 %v628_v57, %v627_v6  ;;  %v655_v12 = vcombine.low %v625_v4, %v641_v7 }
 0x210   : > { %v645_v13 = vpack.i.b16 %v644_v63, %v643_v9  ;;  %v654_v14 = vrot.slane %v647_v10, %v2841_v35  ;;  %v672_v15 = vcombine.low %v621_v2, %v637_v8 }
 0x211   : > { %v662_v16 = vrot.slane %v655_v12, %v2841_v35 }
 0x212   : > { %v679_v17 = vrot.slane %v672_v15, %v2841_v35  ;;  %v680_v18 = vcombine.low %v629_v11, %v645_v13 }
 0x213   : > { %v663_v19 = vcombine.low %v654_v14, %v662_v16 }
 0x214   : > { %v687_v20 = vrot.slane %v680_v18, %v2841_v35 }
 0x215   : > { %v670_v21 = vrot.slane %v663_v19, %v2844_v40 }
 0x216   : > { %v688_v22 = vcombine.low %v679_v17, %v687_v20 }
 0x217   : > { %v671_v23 = vcombine.high %v670_v21, %v2488_v49  ;;  %v701_v25 = vshrl.u32 %v670_v21, 16 }
 0x218   : > { %v695_v24 = vrot.slane %v688_v22, %v2844_v40 }
 0x219   : > { %v709_v29 = vshrl.u32 %v671_v23, 16 }
 0x21a   : > { %v696_v26 = vcombine.high %v695_v24, %v2488_v49  ;;  %v699_v27 = vpack.i.b16 %v695_v24, %v670_v21  ;;  %v702_v28 = vshrl.u32 %v695_v24, 16 }
 0x21c   : > { %v703_v30 = vpack.i.b16 %v702_v28, %v701_v25  ;;  %v707_v31 = vpack.i.b16 %v696_v26, %v671_v23  ;;  %v710_v32 = vshrl.u32 %v696_v26, 16  ;;  %714 = vst.msk [vmem:[#allocation2] sm:$0xf] %vm713_vm2, %v699_v27 }
 0x21e   : > { %v711_v33 = vpack.i.b16 %v710_v32, %v709_v29  ;;  %715 = vst.msk [vmem:[#allocation2 + $0x4] sm:$0xf] %vm713_vm2, %v703_v30  ;;  %716 = vst.msk [vmem:[#allocation2 + $0x8] sm:$0xf] %vm713_vm2, %v707_v31 }
 0x220   : > { %717 = vst.msk [vmem:[#allocation2 + $0xc] sm:$0xf] %vm713_vm2, %v711_v33 }
 0x223   : > { %v1156_v38 = vld [vmem:[#allocation2] sm:$0xf] }
 0x224   : > { %v1169_v41 = vsel %vm1164_vm3, %v1156_v38, 0 }
 0x225   : > { %v1157_v37 = vld [vmem:[#allocation2 + $0x4] sm:$0xf]  ;;  %2031 = vmatpush3.bf16.xpose.msra.mxu1 %v1169_v41 }
 0x226   : > { %v1215_v39 = vsel %vm1164_vm3, %v1157_v37, 0  ;;  %2042 = vmatprep.subr.bf16.mxu1 %v2481_v3  ;;  %v1158_v37 = vld [vmem:[#allocation2 + $0x8] sm:$0xf] }
 0x227   : > { %2037 = vmatpush3.bf16.xpose.msra.mxu0 %v1215_v39 }
 0x228   : > { %2048 = vmatprep.subr.bf16.mxu0 %v2481_v3 }
 0x2be   : > { %v981_v42 = vpop.f32.mrb[4].mxu0 }
 0x2bf   : > { %v987_v43 = vpack.c.bf16 %v981_v42, %v981_v42  ;;  %v2028_v44 = vpop.f32.mrb[5].mxu0  ;;  %v1159_v42 = vld [vmem:[#allocation2 + $0xc] sm:$0xf] }
 0x2c0   : > { %v984_v45 = vpop.f32.mrb[6].mxu0 }
 0x2c1   : > { %989 = vrot.lane.b32.xlu1 %v987_v43, %s2483_s30  ;;  %v2029_v5 = vpop.f32.mrb[7].mxu0  ;;  %v1001_v53 = vrot.slane %v987_v43, %v2841_v35 }
 0x2c2   : > { %v1307_v5 = vsel %vm1164_vm3, %v1159_v42, 0 }
 0x2c5   : > { %991 = vrot.lane.b32.xlu1 %v987_v43, %s2485_s8 }
 0x2c9   : > { %993 = vrot.lane.b32.xlu1 %v987_v43, %s2484_s22  ;;  %v1261_v43 = vsel %vm1164_vm3, %v1158_v37, 0 }
 0x333   : > { %v990_v51 = vpop.permute.xlu1 %989 }
 0x334   : > { %v1035_v60 = vrot.slane %v990_v51, %v2841_v35 }
 0x337   : > { %v992_v52 = vpop.permute.xlu1 %991 }
 0x338   : > { %v1009_v54 = vrot.slane %v992_v52, %v2841_v35 }
 0x33a   : > { %v1010_v55 = vcombine.low %v1001_v53, %v1009_v54  ;;  %v1011_v56 = vcombine.high %v1001_v53, %v1009_v54 }
 0x33b   : > { %v994_v57 = vpop.permute.xlu1 %993 }
 0x33c   : > { %v1018_v58 = vrot.slane %v1010_v55, %v2844_v40  ;;  %v1043_v59 = vrot.slane %v994_v57, %v2841_v35  ;;  %v1025_v61 = vrot.slane %v1011_v56, %v2844_v40 }
 0x33e   : > { %v1044_v62 = vcombine.low %v1035_v60, %v1043_v59  ;;  %v1045_v63 = vcombine.high %v1035_v60, %v1043_v59  ;;  %v1026_v0 = vcombine.high %v1018_v58, %v2488_v49  ;;  %v1027_v4 = vcombine.high %v1025_v61, %v2488_v49 }
 0x33f   : > { %v1066_v6 = vshrl.u32 %v1018_v58, 16  ;;  %v1082_v12 = vshrl.u32 %v1025_v61, 16 }
 0x340   : > { %v1052_v1 = vrot.slane %v1044_v62, %v2844_v40  ;;  %v1059_v2 = vrot.slane %v1045_v63, %v2844_v40  ;;  %v1074_v11 = vshrl.u32 %v1026_v0, 16  ;;  %v1090_v19 = vshrl.u32 %v1027_v4, 16 }
 0x342   : > { %v1060_v7 = vcombine.high %v1052_v1, %v2488_v49  ;;  %v1061_v8 = vcombine.high %v1059_v2, %v2488_v49  ;;  %v1064_v9 = vpack.i.b16 %v1052_v1, %v1018_v58  ;;  %v1067_v10 = vshrl.u32 %v1052_v1, 16 }
 0x343   : > { %v1080_v13 = vpack.i.b16 %v1059_v2, %v1025_v61  ;;  %v1083_v14 = vshrl.u32 %v1059_v2, 16 }
 0x344   : > { %v1068_v15 = vpack.i.b16 %v1067_v10, %v1066_v6  ;;  %v1072_v16 = vpack.i.b16 %v1060_v7, %v1026_v0  ;;  %v1075_v17 = vshrl.u32 %v1060_v7, 16  ;;  %v1088_v18 = vpack.i.b16 %v1061_v8, %v1027_v4 }
 0x345   : > { %v1084_v20 = vpack.i.b16 %v1083_v14, %v1082_v12  ;;  %v1091_v21 = vshrl.u32 %v1061_v8, 16  ;;  %v1094_v22 = vcombine.low %v1064_v9, %v1080_v13 }
 0x346   : > { %v1076_v23 = vpack.i.b16 %v1075_v17, %v1074_v11  ;;  %v1102_v24 = vcombine.low %v1072_v16, %v1088_v18  ;;  %v718_v11 = vpack.c.bf16 %v2882_v46, %v2882_v46 }
 0x347   : > { %v1092_v25 = vpack.i.b16 %v1091_v21, %v1090_v19  ;;  %v1119_v26 = vcombine.low %v1068_v15, %v1084_v20  ;;  %v1101_v27 = vrot.slane %v1094_v22, %v2841_v35 }
 0x348   : > { %v1109_v28 = vrot.slane %v1102_v24, %v2841_v35 }
 0x349   : > { %v1127_v29 = vcombine.low %v1076_v23, %v1092_v25  ;;  %v1126_v31 = vrot.slane %v1119_v26, %v2841_v35 }
 0x34a   : > { %v1110_v30 = vcombine.low %v1101_v27, %v1109_v28  ;;  %v732_v27 = vrot.slane %v718_v11, %v2841_v35 }
 0x34b   : > { %v1134_v32 = vrot.slane %v1127_v29, %v2841_v35 }
 0x34c   : > { %v1117_v34 = vrot.slane %v1110_v30, %v2844_v40 }
 0x34d   : > { %v1135_v33 = vcombine.low %v1126_v31, %v1134_v32 }
 0x34e   : > { %v1147_v39 = vshrl.u32 %v1117_v34, 16  ;;  %v1118_v47 = vcombine.high %v1117_v34, %v2488_v49 }
 0x34f   : > { %v1142_v36 = vrot.slane %v1135_v33, %v2844_v40 }
 0x350   : > { %v1153_v51 = vshrl.u32 %v1118_v47, 16 }
 0x351   : > { %v1146_v38 = vpack.i.b16 %v1142_v36, %v1117_v34  ;;  %v1148_v41 = vshrl.u32 %v1142_v36, 16  ;;  %v1143_v45 = vcombine.high %v1142_v36, %v2488_v49 }
 0x353   : > { %2033 = vmatmul.mubr.msk.bf16.vlgmr.msra.gmra.mrb[4].mxu1 %vm1164_vm3, %v1146_v38  ;;  %v1149_v44 = vpack.i.b16 %v1148_v41, %v1147_v39  ;;  %v1154_v48 = vshrl.u32 %v1143_v45, 16  ;;  %v1152_v50 = vpack.i.b16 %v1143_v45, %v1118_v47 }
 0x354   : > { %2043 = vmatpush3.bf16.xpose.msra.mxu1 %v1261_v43  ;;  %2044 = vmatprep.mubr.msk.bf16.mxu1 %vm2482_vm1, %v2481_v3 }
 0x355   : > { %2039 = vmatmul.mubr.msk.bf16.vlgmr.msra.gmra.mrb[8].mxu0 %vm1164_vm3, %v1149_v44  ;;  %2054 = vmatprep.subr.bf16.mxu1 %v2481_v3  ;;  %v1155_v52 = vpack.i.b16 %v1154_v48, %v1153_v51 }
 0x356   : > { %2049 = vmatpush3.bf16.xpose.msra.mxu0 %v1307_v5  ;;  %2050 = vmatprep.mubr.msk.bf16.mxu0 %vm2482_vm1, %v2481_v3 }
 0x357   : > { %2060 = vmatprep.subr.bf16.mxu0 %v2481_v3 }
 0x35b   : > { %2045 = vmatmul.mubr.msk.bf16.vlgmr.msra.gmra.mrb[8].mxu1 %vm1164_vm3, %v1152_v50 }
 0x35c   : > { %2056 = vmatprep.mubr.msk.bf16.mxu1 %vm2482_vm1, %v2481_v3 }
 0x35d   : > { %2051 = vmatmul.mubr.msk.bf16.vlgmr.msra.gmra.mrb[12].mxu0 %vm1164_vm3, %v1155_v52 }
 0x35e   : > { %2062 = vmatprep.mubr.msk.bf16.mxu0 %vm2482_vm1, %v2481_v3 }
 0x426   : > { %v1205_v53 = vpop.f32.mrb[4].mxu1 }
 0x427   : > { %v2034_v54 = vpop.f32.mrb[5].mxu1  ;;  %v1349_v55 = vsel %vm1164_vm3, %v1205_v53, -inf }
 0x428   : > { %1350 = vmax.xlane.f32.xlu1 %v1349_v55  ;;  %v1208_v56 = vpop.f32.mrb[6].mxu1  ;;  %v1251_v57 = vpop.f32.mrb[8].mxu0 }
 0x429   : > { %v2035_v58 = vpop.f32.mrb[7].mxu1  ;;  %v2040_v59 = vpop.f32.mrb[9].mxu0  ;;  %v1352_v60 = vsel %vm1164_vm3, %v1251_v57, -inf }
 0x42a   : > { %1353 = vmax.xlane.f32.xlu0 %v1352_v60  ;;  %v1254_v61 = vpop.f32.mrb[10].mxu0 }
 0x42b   : > { %v2041_v62 = vpop.f32.mrb[11].mxu0 }
 0x42e   : > { %v1297_v63 = vpop.f32.mrb[8].mxu1 }
 0x42f   : > { %v2046_v0 = vpop.f32.mrb[9].mxu1  ;;  %v1355_v1 = vsel %vm1164_vm3, %v1297_v63, -inf }
 0x430   : > { %1356 = vmax.xlane.f32.xlu1 %v1355_v1  ;;  %v1300_v2 = vpop.f32.mrb[10].mxu1  ;;  %v1343_v4 = vpop.f32.mrb[12].mxu0 }
 0x431   : > { %v2047_v6 = vpop.f32.mrb[11].mxu1  ;;  %v2052_v7 = vpop.f32.mrb[13].mxu0  ;;  %v1358_v10 = vsel %vm1164_vm3, %v1343_v4, -inf }
 0x432   : > { %v1346_v8 = vpop.f32.mrb[14].mxu0 }
 0x433   : > { %v2053_v9 = vpop.f32.mrb[15].mxu0 }
 0x434   : > { %1359 = vmax.xlane.f32.xlu1 %v1358_v10 }
 0x440   : > { %720 = vrot.lane.b32.xlu0 %v718_v11, %s2483_s30  ;;  %s2489_s30 = smov [#allocation13]  }
 0x445   : > { %722 = vrot.lane.b32.xlu1 %v718_v11, %s2485_s8 }
 0x449   : > { %724 = vrot.lane.b32.xlu1 %v718_v11, %s2484_s22  ;;  %s2382_s22 = sshll.u32 %s2489_s30, 4  ;;  %s2383_s22 = int_to_ptr.vmem [resolvable:$false] %s2382_s22 }
 0x44a   : > { %s2384_s8 = scalar_lea.vmem %s2383_s22, 256  ;;  %p2385_p1 = scmp.lt.s32.totalorder %s3019_s17, %s2383_s22 }
 0x44b   : > { %p2386_p13 = scmp.lt.s32.totalorder %s2384_s8, %s2378_s11 }
 0x44d   : > { %p2387_p3 = por %p2386_p13, %p2385_p1 }
 0x44f   : > { %p2388_p5 = pnand %p2387_p3, %p2381_p8 }
 0x4b5   : > { %v1351_v12 = vpop.xlane.xlu1 %1350 }
 0x4b6   : > { %v1361_v13 = vsub.f32 %v1205_v53, %v1351_v12 }
 0x4b7   : > { %v1354_v14 = vpop.xlane.xlu0 %1353 }
 0x4b8   : > { %v1365_v15 = vmul.f32 1.442695, %v1361_v13  ;;  %v1362_v16 = vsub.f32 %v1251_v57, %v1354_v14 }
 0x4ba   : > { %2218 = vpow2.f32 %v1365_v15  ;;  %v1367_v17 = vmul.f32 1.442695, %v1362_v16 }
 0x4bb   : > { %v721_v30 = vpop.permute.xlu0 %720 }
 0x4bc   : > { %2220 = vpow2.f32 %v1367_v17  ;;  %v766_v37 = vrot.slane %v721_v30, %v2841_v35 }
 0x4bd   : > { %v1357_v18 = vpop.xlane.xlu1 %1356 }
 0x4be   : > { %v1363_v19 = vsub.f32 %v1297_v63, %v1357_v18 }
 0x4c0   : > { %v1369_v20 = vmul.f32 1.442695, %v1363_v19 }
 0x4c1   : > { %v1360_v21 = vpop.xlane.xlu1 %1359 }
 0x4c2   : > { %2222 = vpow2.f32 %v1369_v20  ;;  %v1364_v46 = vsub.f32 %v1343_v4, %v1360_v21 }
 0x4c4   : > { %v2929_v22 = vpop.eup %2218  ;;  %v1371_v23 = vmul.f32 1.442695, %v1364_v46 }
 0x4c5   : > { %v723_v24 = vpop.permute.xlu1 %722  ;;  %v1373_v25 = vsel %vm1164_vm3, %v2929_v22, 0.0 }
 0x4c6   : > { %v2933_v26 = vpop.eup %2220  ;;  %2224 = vpow2.f32 %v1371_v23  ;;  %v740_v28 = vrot.slane %v723_v24, %v2841_v35  ;;  %1374 = vadd.xlane.f32.xlu0 %v1373_v25 }
 0x4c7   : > { %v1376_v29 = vsel %vm1164_vm3, %v2933_v26, 0.0 }
 0x4c8   : > { %v741_v31 = vcombine.low %v732_v27, %v740_v28  ;;  %v742_v32 = vcombine.high %v732_v27, %v740_v28  ;;  %1377 = vadd.xlane.f32.xlu1 %v1376_v29 }
 0x4c9   : > { %v725_v33 = vpop.permute.xlu1 %724 }
 0x4ca   : > { %v749_v34 = vrot.slane %v741_v31, %v2844_v40  ;;  %v774_v36 = vrot.slane %v725_v33, %v2841_v35  ;;  %v756_v39 = vrot.slane %v742_v32, %v2844_v40 }
 0x4cc   : > { %v2942_v38 = vpop.eup %2222  ;;  %v775_v41 = vcombine.low %v766_v37, %v774_v36  ;;  %v776_v42 = vcombine.high %v766_v37, %v774_v36  ;;  %v757_v44 = vcombine.high %v749_v34, %v2488_v49  ;;  %v758_v48 = vcombine.high %v756_v39, %v2488_v49 }
 0x4cd   : > { %v1379_v43 = vsel %vm1164_vm3, %v2942_v38, 0.0  ;;  %v797_v50 = vshrl.u32 %v749_v34, 16  ;;  %v813_v51 = vshrl.u32 %v756_v39, 16 }
 0x4ce   : > { %1380 = vadd.xlane.f32.xlu0 %v1379_v43  ;;  %v783_v45 = vrot.slane %v775_v41, %v2844_v40  ;;  %v790_v5 = vrot.slane %v776_v42, %v2844_v40  ;;  %v805_v56 = vshrl.u32 %v757_v44, 16  ;;  %v821_v0 = vshrl.u32 %v758_v48, 16 }
 0x4d0   : > { %v2950_v47 = vpop.eup %2224  ;;  %v791_v52 = vcombine.high %v783_v45, %v2488_v49  ;;  %v792_v53 = vcombine.high %v790_v5, %v2488_v49  ;;  %v795_v54 = vpack.i.b16 %v783_v45, %v749_v34  ;;  %v798_v55 = vshrl.u32 %v783_v45, 16 }
 0x4d1   : > { %v811_v57 = vpack.i.b16 %v790_v5, %v756_v39  ;;  %v814_v58 = vshrl.u32 %v790_v5, 16  ;;  %v1382_v59 = vsel %vm1164_vm3, %v2950_v47, 0.0 }
 0x4d2   : > { %v799_v60 = vpack.i.b16 %v798_v55, %v797_v50  ;;  %v803_v61 = vpack.i.b16 %v791_v52, %v757_v44  ;;  %v806_v62 = vshrl.u32 %v791_v52, 16  ;;  %v819_v63 = vpack.i.b16 %v792_v53, %v758_v48  ;;  %1383 = vadd.xlane.f32.xlu0 %v1382_v59 }
 0x4d3   : > { %v815_v1 = vpack.i.b16 %v814_v58, %v813_v51  ;;  %v822_v2 = vshrl.u32 %v792_v53, 16  ;;  %v825_v4 = vcombine.low %v795_v54, %v811_v57  ;;  %v1587_v54 = vld [vmem:[#allocation12 + $0x4] sm:$0xf]  ;;  %v1588_v57 = vld [vmem:[#allocation12 + $0x8] sm:$0xf] }
 0x4d4   : > { %v807_v6 = vpack.i.b16 %v806_v62, %v805_v56  ;;  %v833_v7 = vcombine.low %v803_v61, %v819_v63  ;;  %v1686_v61 = vsel %vm1400_vm4, %v1588_v57, 0 }
 0x4d5   : > { %v823_v8 = vpack.i.b16 %v822_v2, %v821_v0  ;;  %v850_v9 = vcombine.low %v799_v60, %v815_v1  ;;  %v832_v10 = vrot.slane %v825_v4, %v2841_v35 }
 0x4d6   : > { %v840_v11 = vrot.slane %v833_v7, %v2841_v35 }
 0x4d7   : > { %v858_v12 = vcombine.low %v807_v6, %v823_v8  ;;  %v857_v14 = vrot.slane %v850_v9, %v2841_v35 }
 0x4d8   : > { %v841_v13 = vcombine.low %v832_v10, %v840_v11 }
 0x4d9   : > { %v865_v15 = vrot.slane %v858_v12, %v2841_v35 }
 0x4da   : > { %v848_v16 = vrot.slane %v841_v13, %v2844_v40 }
 0x4db   : > { %v866_v17 = vcombine.low %v857_v14, %v865_v15 }
 0x4dc   : > { %v849_v18 = vcombine.high %v848_v16, %v2488_v49  ;;  %v879_v46 = vshrl.u32 %v848_v16, 16 }
 0x4dd   : > { %v873_v19 = vrot.slane %v866_v17, %v2844_v40 }
 0x4de   : > { %v887_v27 = vshrl.u32 %v849_v18, 16 }
 0x4df   : > { %v874_v20 = vcombine.high %v873_v19, %v2488_v49  ;;  %v877_v21 = vpack.i.b16 %v873_v19, %v848_v16  ;;  %v880_v23 = vshrl.u32 %v873_v19, 16 }
 0x4e1   : > { %v881_v24 = vpack.i.b16 %v880_v23, %v879_v46  ;;  %v885_v25 = vpack.i.b16 %v874_v20, %v849_v18  ;;  %v888_v28 = vshrl.u32 %v874_v20, 16  ;;  %891 = vst.msk [vmem:[#allocation3] sm:$0xf] %vm713_vm2, %v877_v21 }
 0x4e3   : > { %v889_v29 = vpack.i.b16 %v888_v28, %v887_v27  ;;  %892 = vst.msk [vmem:[#allocation3 + $0x4] sm:$0xf] %vm713_vm2, %v881_v24  ;;  %893 = vst.msk [vmem:[#allocation3 + $0x8] sm:$0xf] %vm713_vm2, %v885_v25 }
 0x4e5   : > { %894 = vst.msk [vmem:[#allocation3 + $0xc] sm:$0xf] %vm713_vm2, %v889_v29 }
 0x4e8   : > { %v1160_v35 = vld [vmem:[#allocation3] sm:$0xf] }
 0x4e9   : > { %v1402_v40 = vsel %vm1400_vm4, %v1160_v35, 0 }
 0x4ea   : > { %2055 = vmatpush3.bf16.msra.mxu1 %v1402_v40  ;;  %v1161_v49 = vld [vmem:[#allocation3 + $0x4] sm:$0xf]  ;;  %v1162_v41 = vld [vmem:[#allocation3 + $0x8] sm:$0xf] }
 0x4eb   : > { %v1448_v30 = vsel %vm1400_vm4, %v1161_v49, 0  ;;  %2066 = vmatprep.subr.bf16.mxu1 %v2481_v3  ;;  %v1494_v5 = vsel %vm1400_vm4, %v1162_v41, 0 }
 0x4ec   : > { %2061 = vmatpush3.bf16.msra.mxu0 %v1448_v30  ;;  %v1163_v44 = vld [vmem:[#allocation3 + $0xc] sm:$0xf] }
 0x4ed   : > { %2072 = vmatprep.subr.bf16.mxu0 %v2481_v3 }
 0x553   : > { %v1375_v31 = vpop.xlane.xlu0 %1374 }
 0x554   : > { %2226 = vrcp.f32 %v1375_v31 }
 0x555   : > { %v1378_v32 = vpop.xlane.xlu1 %1377 }
 0x556   : > { %2228 = vrcp.f32 %v1378_v32 }
 0x55b   : > { %v1381_v33 = vpop.xlane.xlu0 %1380 }
 0x55c   : > { %2230 = vrcp.f32 %v1381_v33 }
 0x55e   : > { %v2227_v34 = vpop.eup %2226 }
 0x55f   : > { %v1389_v36 = vmul.f32 %v2227_v34, %v2929_v22  ;;  %v1384_v39 = vpop.xlane.xlu0 %1383  ;;  %v1540_v22 = vsel %vm1400_vm4, %v1163_v44, 0 }
 0x560   : > { %v2229_v37 = vpop.eup %2228  ;;  %2232 = vrcp.f32 %v1384_v39 }
 0x561   : > { %v1390_v42 = vmul.f32 %v2229_v37, %v2933_v26  ;;  %v1393_v43 = vpack.c.bf16 %v1389_v36, %v1389_v36  ;;  %v1586_v26 = vld [vmem:[#allocation12] sm:$0xf] }
 0x562   : > { %v1594_v52 = vsel %vm1400_vm4, %v1586_v26, 0 }
 0x563   : > { %v1394_v45 = vpack.c.bf16 %v1390_v42, %v1390_v42  ;;  %2057 = vmatmul.mubr.msk.bf16.vlgmr.msra.gmra.mrb[12].mxu1 %vm1164_vm3, %v1393_v43 }
 0x564   : > { %2067 = vmatpush3.bf16.msra.mxu1 %v1494_v5  ;;  %2068 = vmatprep.mubr.msk.bf16.mxu1 %vm2482_vm1, %v2481_v3 }
 0x565   : > { %2063 = vmatmul.mubr.msk.bf16.vlgmr.msra.gmra.mrb[16].mxu0 %vm1164_vm3, %v1394_v45  ;;  %2078 = vmatprep.subr.bf16.mxu1 %v2481_v3 }
 0x566   : > { %v2231_v48 = vpop.eup %2230  ;;  %2073 = vmatpush3.bf16.msra.mxu0 %v1540_v22  ;;  %2074 = vmatprep.mubr.msk.bf16.mxu0 %vm2482_vm1, %v2481_v3 }
 0x567   : > { %v1391_v50 = vmul.f32 %v2231_v48, %v2942_v38  ;;  %2084 = vmatprep.subr.bf16.mxu0 %v2481_v3  ;;  %v1640_v38 = vsel %vm1400_vm4, %v1587_v54, 0 }
 0x569   : > { %v1395_v51 = vpack.c.bf16 %v1391_v50, %v1391_v50 }
 0x56a   : > { %v2233_v53 = vpop.eup %2232 }
 0x56b   : > { %2069 = vmatmul.mubr.msk.bf16.vlgmr.msra.gmra.mrb[16].mxu1 %vm1164_vm3, %v1395_v51  ;;  %v1392_v55 = vmul.f32 %v2233_v53, %v2950_v47  ;;  %v1589_v47 = vld [vmem:[#allocation12 + $0xc] sm:$0xf] }
 0x56c   : > { %2079 = vmatpush3.bf16.msra.mxu1 %v1594_v52  ;;  %2080 = vmatprep.mubr.msk.bf16.mxu1 %vm2482_vm1, %v2481_v3  ;;  %v1732_v4 = vsel %vm1400_vm4, %v1589_v47, 0 }
 0x56d   : > { %2090 = vmatprep.subr.bf16.mxu1 %v2481_v3  ;;  %v1396_v56 = vpack.c.bf16 %v1392_v55, %v1392_v55 }
 0x56f   : > { %2075 = vmatmul.mubr.msk.bf16.vlgmr.msra.gmra.mrb[20].mxu0 %vm1164_vm3, %v1396_v56 }
 0x570   : > { %2085 = vmatpush3.bf16.msra.mxu0 %v1640_v38  ;;  %2086 = vmatprep.mubr.msk.bf16.mxu0 %vm2482_vm1, %v2481_v3 }
 0x571   : > { %2096 = vmatprep.subr.bf16.mxu0 %v2481_v3 }
 0x636   : > { %v1438_v58 = vpop.f32.mrb[12].mxu1 }
 0x637   : > { %v1582_v59 = vpack.c.bf16 %v1438_v58, %v1438_v58  ;;  %v2058_v60 = vpop.f32.mrb[13].mxu1 }
 0x638   : > { %v1441_v62 = vpop.f32.mrb[14].mxu1  ;;  %v1484_v63 = vpop.f32.mrb[16].mxu0 }
 0x639   : > { %v1583_v0 = vpack.c.bf16 %v1484_v63, %v1484_v63  ;;  %v2059_v1 = vpop.f32.mrb[15].mxu1  ;;  %v2064_v2 = vpop.f32.mrb[17].mxu0  ;;  %2081 = vmatmul.mubr.msk.bf16.vlgmr.msra.gmra.mrb[20].mxu1 %vm1164_vm3, %v1582_v59 }
 0x63a   : > { %v1487_v6 = vpop.f32.mrb[18].mxu0  ;;  %2091 = vmatpush3.bf16.msra.mxu1 %v1686_v61  ;;  %2092 = vmatprep.mubr.msk.bf16.mxu1 %vm2482_vm1, %v2481_v3 }
 0x63b   : > { %v2065_v7 = vpop.f32.mrb[19].mxu0  ;;  %2087 = vmatmul.mubr.msk.bf16.vlgmr.msra.gmra.mrb[24].mxu0 %vm1164_vm3, %v1583_v0 }
 0x63c   : > { %2097 = vmatpush3.bf16.msra.mxu0 %v1732_v4  ;;  %2098 = vmatprep.mubr.msk.bf16.mxu0 %vm2482_vm1, %v2481_v3 }
 0x63e   : > { %v1530_v8 = vpop.f32.mrb[16].mxu1 }
 0x63f   : > { %v1584_v9 = vpack.c.bf16 %v1530_v8, %v1530_v8  ;;  %v2070_v10 = vpop.f32.mrb[17].mxu1 }
 0x640   : > { %v1533_v11 = vpop.f32.mrb[18].mxu1 }
 0x641   : > { %v2071_v12 = vpop.f32.mrb[19].mxu1  ;;  %2093 = vmatmul.mubr.msk.bf16.vlgmr.msra.gmra.mrb[24].mxu1 %vm1164_vm3, %v1584_v9 }
 0x642   : > { %v1576_v13 = vpop.f32.mrb[20].mxu0 }
 0x643   : > { %v1585_v14 = vpack.c.bf16 %v1576_v13, %v1576_v13  ;;  %v2076_v15 = vpop.f32.mrb[21].mxu0 }
 0x644   : > { %v1579_v16 = vpop.f32.mrb[22].mxu0 }
 0x645   : > { %v2077_v17 = vpop.f32.mrb[23].mxu0  ;;  %2099 = vmatmul.mubr.msk.bf16.vlgmr.msra.gmra.mrb[28].mxu0 %vm1164_vm3, %v1585_v14 }
 0x70c   : > { %v1630_v18 = vpop.f32.mrb[20].mxu1 }
 0x70d   : > { %v2082_v19 = vpop.f32.mrb[21].mxu1  ;;  %v1774_v21 = vsel %vm440_vm0, %v1630_v18, 0.0 }
 0x70e   : > { %v1633_v20 = vpop.f32.mrb[22].mxu1  ;;  %v1676_v3 = vpop.f32.mrb[24].mxu0 }
 0x70f   : > { %v1775_v46 = vsel %vm440_vm0, %v1676_v3, 0.0  ;;  %v2083_v23 = vpop.f32.mrb[23].mxu1  ;;  %v2088_v24 = vpop.f32.mrb[25].mxu0 }
 0x710   : > { %v1776_v25 = vadd.f32 %v1775_v46, %v1774_v21  ;;  %v1679_v27 = vpop.f32.mrb[26].mxu0 }
 0x711   : > { %v2089_v28 = vpop.f32.mrb[27].mxu0 }
 0x714   : > { %v1722_v29 = vpop.f32.mrb[24].mxu1 }
 0x715   : > { %v1777_v35 = vsel %vm440_vm0, %v1722_v29, 0.0  ;;  %v2094_v40 = vpop.f32.mrb[25].mxu1 }
 0x716   : > { %v1778_v49 = vadd.f32 %v1777_v35, %v1776_v25  ;;  %v1725_v30 = vpop.f32.mrb[26].mxu1 }
 0x717   : > { %v2095_v31 = vpop.f32.mrb[27].mxu1 }
 0x718   : > { %v1768_v32 = vpop.f32.mrb[28].mxu0 }
 0x719   : > { %v1779_v33 = vsel %vm440_vm0, %v1768_v32, 0.0  ;;  %v2100_v34 = vpop.f32.mrb[29].mxu0 }
 0x71a   : > { %v1780_v36 = vadd.f32 %v1779_v33, %v1778_v49  ;;  %v1771_v37 = vpop.f32.mrb[30].mxu0 }
 0x71b   : > { %v2101_v39 = vpop.f32.mrb[31].mxu0 }
 0x71c   : > { %1781 = vst.msk [vmem:[%s417_s15] sm:$0xff] %vm440_vm0, %v1780_v36 }
 0x71d   : > { %2391 = shalt.err (!%p2388_p5)
}
 0x71e   : > { %s2392_s4 = scalar_lea.hbm %s3017_s16, 128  ;;  %s2396_s20 = scalar_lea.hbm %s3107_s13, 256 }
 0x71f   : > { %p2393_p6 = scmp.ne.s32.totalorder %s3017_s16, %s2392_s4  ;;  %p2397_p12 = scmp.lt.u32.totalorder %s3017_s16, %s3107_s13 }
 0x720   : > { %p2398_p11 = scmp.lt.u32.totalorder %s2396_s20, %s2392_s4  ;;  %p2400_p0 = scmp.lt.u32.totalorder %s2392_s4, %s3017_s16 }
 0x721   : > { %p2394_p10 = pnand %p2393_p6, %p3108_p2 }
 0x722   : > { %p2399_p9 = por %p2398_p11, %p2397_p12 }
 0x723   : > { %p2395_p7 = pneg %p2394_p10 }
 0x724   : > { %p2401_p4 = por %p2400_p0, %p2399_p9 }
 0x726   : > { %p2402_p8 = pnand %p2401_p4, %p2395_p7 }
 0x728   : > { %2405 = shalt.err (!%p2402_p8)
}
 0x729   : > { %2118 = dma.vmem_to_hbm [thread:$0]  (%p3108_p2), %s3019_s17, 128, %s3017_s16, %s1783_s12  }
 0x72a PF: > { %s3109_s0 = sld [smem:[#allocation19_spill]]  ;;  %s3110_s15 = sld [smem:[#allocation21_spill]] }
 0x72b   : > { %p3112_p13 = scmp.ge.s32.totalorder %s2472_s10, 2 }
 0x730   : > { %s1809_s24 = sand.u32 1, %s3109_s0   ;;  %p3111_p1 = scmp.ne.s32.totalorder %s3110_s15, 0 }
 0x731   : > { %s1810_s25 = scalar_lea.sflag [#allocation6], %s1809_s24 }
 0x732   : > { %p2138_p3 = pnand %p3112_p13, %p3111_p1 }
 0x734   : > { %2447 = dma.done.wait (!%p2138_p3), %s1810_s25, 128  }
 0x735   : > { %2449 = vsyncadd (!%p2138_p3), %s1810_s25, 4294967168  ;;  %s28_s10 = sadd.s32 1, %s2472_s10   ;;  %s3113_s27 = smov %s2456_s28 }
 0x736   : > { %p25_p5 = scmp.ge.s32.totalorder %s28_s10, 4   ;;  %s3114_s28 = smov %s2460_s29 }
 0x737   : > { %s3115_s29 = smov %s2706_s14  ;;  %s3116_s30 = smov %s2468_s9 }
 0x738   : > { %s3117_s9 = smov %s3119_s18  ;;  %27 = sbr.rel (!%p25_p5) target bundleno = 13 (0xd), region = 126 }
 0x73f   :  { %1815 = vsyncpa [#allocation5], 1 }
 0x740   :  { %1817 = vsyncpa [#allocation5 + $0x1], 1 }
 0x741   :  { %1818 = vsyncpa [#allocation8], 1 }
 0x742   :  { %1820 = vsyncpa [#allocation8 + $0x1], 1 }
 0x743   :  { %1821 = vsyncpa [#allocation11], 1 }
 0x744   :  { %1822 = vsyncpa [#allocation6], 1 }
 0x745   :  { %1824 = vsyncpa [#allocation6 + $0x1], 1 }

</bundles_post_ra>
